<compile_context>
chip_gen: v5e
topology: v5e:2x2
jax: 0.10.0
libtpu: 0.0.40
codegen_flags: <defaults>
</compile_context>

<pallas_src>
import jax
import jax.numpy as jnp
from jax.experimental import pallas as pl
from jax.experimental.pallas import tpu as pltpu


# ----------------------------- Pallas kernels -----------------------------

def _cmix_kernel(w_ref, x_ref, o_ref):
    """1x1 conv as VPU MACs over a lane-dense (Cin, TN) tile.

    w_ref: SMEM (Cout, Cin) scalars; x_ref: VMEM (Cin, TN); o_ref: VMEM (Cout, TN).
    Cin/Cout are tiny (<=4) so the channel loops are fully unrolled; the MXU is
    deliberately NOT used (it would be >=96% idle at these contraction sizes).
    """
    cout = o_ref.shape[0]
    cin = x_ref.shape[0]
    for o in range(cout):
        acc = w_ref[o, 0] * x_ref[pl.ds(0, 1), :]
        for c in range(1, cin):
            acc = acc + w_ref[o, c] * x_ref[pl.ds(c, 1), :]
        o_ref[pl.ds(o, 1), :] = acc


def channel_mix_nchw(x, w, *, tile_n=32768):
    """1x1 convolution: x [B, Cin, H, W], w [Cout, Cin] -> [B, Cout, H, W].

    Lane-dense [Cin, B*H*W] slab, tiled along N so the kernel double-buffers
    and fits VMEM at realistic sizes (at toy sizes one tile covers everything).
    """
    Bn, Cin, H, W = x.shape
    Cout = w.shape[0]
    N = Bn * H * W
    assert N % 128 == 0, "channel_mix_nchw expects a lane-dense slab (N % 128 == 0)"
    x_slab = jnp.transpose(x, (1, 0, 2, 3)).reshape(Cin, N)
    tn = min(N, tile_n)
    out = pl.pallas_call(
        _cmix_kernel,
        out_shape=jax.ShapeDtypeStruct((Cout, N), jnp.float32),
        grid=(pl.cdiv(N, tn),),
        in_specs=[pl.BlockSpec(memory_space=pltpu.MemorySpace.SMEM),
                  pl.BlockSpec((Cin, tn), lambda i: (0, i))],
        out_specs=pl.BlockSpec((Cout, tn), lambda i: (0, i)),
        compiler_params=pltpu.CompilerParams(
            dimension_semantics=("parallel",)),
    )(w, x_slab)
    return jnp.transpose(out.reshape(Cout, Bn, H, W), (1, 0, 2, 3))


def _mm_shared_rhs_kernel(x_ref, e_ref, o_ref):
    """One MXU matmul per batch element against the shared warped-identity E.

    x_ref: (1, bands*S, S) stacked band/spatial rows; e_ref: (1, S, S);
    o_ref: (1, bands*S, S).  Collapses the per-band (S,S)@(S,S) dots into a
    single push chain with M = bands*S.  Output last dim is S (masked stores
    only at toy S<128; unmasked at realistic S).
    """
    o_ref[0] = jnp.dot(x_ref[0], e_ref[0], preferred_element_type=jnp.float32)


def mm_shared_rhs(x_stacked, e):
    """x_stacked: (Bn, bands*S, S) f32, e: (Bn, S, S) f32 -> (Bn, bands*S, S)."""
    Bn, M, S = x_stacked.shape
    blk_x = pl.BlockSpec((1, M, S), lambda b: (b, 0, 0))
    blk_e = pl.BlockSpec((1, S, S), lambda b: (b, 0, 0))
    return pl.pallas_call(
        _mm_shared_rhs_kernel,
        out_shape=jax.ShapeDtypeStruct((Bn, M, S), jnp.float32),
        grid=(Bn,),
        in_specs=[blk_x, blk_e],
        out_specs=blk_x,
        compiler_params=pltpu.CompilerParams(
            dimension_semantics=("parallel",)),
    )(x_stacked, e)


def _stage_kernel(eta_ref, x_ref, hsp_ref, xp1_ref, pan_ref, r_ref, den_ref,
                  o_ref):
    """One FusionM eta update + Denoise on lane-dense (bands, S*S) slabs.

      s    = R(Xpk)            = sum_c r_c * x_c           (XLU sublane reduce)
      Uk   = Xpk + eta*(HS_p + r*PAN - 0.25*(XW@E) - r*s)  (VPU, broadcasted)
      out  = Uk + den_w @ Uk    (residual 1x1 Denoise)      (MXU)

    The 0.25 from B(B_T(.)) and PAN_p = r*PAN are folded in here so the matmul
    kernel stays a bare shared-RHS dot.  r / den_w live in VMEM (matmul / lane
    broadcast operands); only the true scalar eta stays in SMEM.
    """
    eta = eta_ref[0]
    x = x_ref[0]                                   # (bands, L)
    r = r_ref[...]                                 # (bands, 1)
    s = jnp.sum(r * x, axis=0, keepdims=True)      # (1, L)   rank-1 R_T(R(.))
    sp = s - pan_ref[0]                            # (1, L)   R(Xpk) - PAN
    xp2_minus_panp = r * jnp.broadcast_to(sp, x.shape)       # X_p2 - PAN_p
    uk = x + eta * (hsp_ref[0] - xp2_minus_panp) - (0.25 * eta) * xp1_ref[0]
    o_ref[0] = uk + jnp.dot(den_ref[...], uk,
                            preferred_element_type=jnp.float32)


def fused_stage(xpk_slab, hsp_slab, xp1m_slab, pan_slab, r_col, den_w, eta):
    Bn, bands, L = xpk_slab.shape
    slab = pl.BlockSpec((1, bands, L), lambda b: (b, 0, 0))
    pan_spec = pl.BlockSpec((1, 1, L), lambda b: (b, 0, 0))
    wvec = pl.BlockSpec((bands, 1), lambda b: (0, 0))
    wmat = pl.BlockSpec((bands, bands), lambda b: (0, 0))
    smem = pl.BlockSpec(memory_space=pltpu.MemorySpace.SMEM)
    eta_arr = jnp.reshape(jnp.asarray(eta, jnp.float32), (1,))
    return pl.pallas_call(
        _stage_kernel,
        out_shape=jax.ShapeDtypeStruct((Bn, bands, L), jnp.float32),
        grid=(Bn,),
        in_specs=[smem, slab, slab, slab, pan_spec, wvec, wmat],
        out_specs=slab,
        compiler_params=pltpu.CompilerParams(
            dimension_semantics=("parallel",)),
    )(eta_arr, xpk_slab, hsp_slab, xp1m_slab, pan_slab, r_col, den_w)


# -------------------- synthetic injected operators (glue) --------------------
# R / R_T / REG / conv_p / Denoise are 1x1 convs -> folded into the Pallas
# kernels above (R_T(R(.)) exploits its rank-1 structure; R_T(PAN) and Denoise
# live inside the stage kernel).  B / B_T are a 2x2 avg-pool pair, so
# B(B_T(x)) == 0.25*x exactly and only B_T survives (applied to HS); the STF
# warp is a data-dependent gather and stays in XLA.

def B_T_op(x):           # adjoint of 2x2 avg pool: spread each value / 4
    return jnp.repeat(jnp.repeat(x, 2, axis=2), 2, axis=3) * 0.25


def stf_warp(hs, dsp):
    """Spatial-transformer warp. hs: [B,H,W,C], dsp: [B,H,W,2] pixel flow."""
    # TODO(synk): gather-based bilinear warping stays in plain JAX (no clean
    # Pallas equivalent for the data-dependent 2-D gather at this size).
    Bn, H, W, C = hs.shape
    yy, xx = jnp.meshgrid(jnp.arange(H, dtype=jnp.float32),
                          jnp.arange(W, dtype=jnp.float32), indexing="ij")
    xs = jnp.clip(xx[None] + dsp[..., 0], 0.0, W - 1.0)
    ys = jnp.clip(yy[None] + dsp[..., 1], 0.0, H - 1.0)
    x0 = jnp.floor(xs).astype(jnp.int32)
    x1 = jnp.minimum(x0 + 1, W - 1)
    y0 = jnp.floor(ys).astype(jnp.int32)
    y1 = jnp.minimum(y0 + 1, H - 1)
    wx = (xs - x0.astype(jnp.float32))[..., None]
    wy = (ys - y0.astype(jnp.float32))[..., None]
    bidx = jnp.arange(Bn)[:, None, None]
    g = lambda yi, xi: hs[bidx, yi, xi]
    return (g(y0, x0) * (1 - wx) * (1 - wy) + g(y0, x1) * wx * (1 - wy)
            + g(y1, x0) * (1 - wx) * wy + g(y1, x1) * wx * wy)


def use_dsp(hs_nchw, dsp_nchw):
    hs = jnp.transpose(hs_nchw, (0, 2, 3, 1))
    dsp = jnp.transpose(dsp_nchw, (0, 2, 3, 1))
    out = stf_warp(hs, dsp)
    return jnp.transpose(out, (0, 3, 1, 2))


# ------------------------------ FandD_H forward ------------------------------

def fandd_h_forward(params, PAN, PAN_reg, HS, DSP_T):
    Bn, bands, h, _ = HS.shape
    S = 2 * h
    L = S * S

    # ---- stage-invariant precompute (identical in F1/F2/F3 -> done once) ----
    I_small = channel_mix_nchw(HS, params["conv_p"])            # bands -> 1
    # torch F.interpolate(mode='bilinear', align_corners=False) ~ jax bilinear
    # (both half-pixel-centered).
    I = jax.image.resize(I_small, (Bn, 1, S, S), method="bilinear")
    DSP = channel_mix_nchw(jnp.concatenate([I, PAN_reg], axis=1),
                           params["reg_w"])                     # REG: 2 -> 2

    # E_as_D dedup: the warp of the identity is channel-independent -> one
    # (S, S) plane per batch element shared by every band.
    eye1 = jnp.broadcast_to(jnp.eye(S, dtype=jnp.float32), (Bn, 1, S, S))
    E = use_dsp(eye1, jax.lax.stop_gradient(DSP))[:, 0]          # (Bn, S, S)

    # HS_p = B_T(HS) @ E  as one shared-RHS (bands*S, S) @ (S, S) matmul.
    hsp_slab = mm_shared_rhs(B_T_op(HS).reshape(Bn, bands * S, S), E)
    hsp_slab = hsp_slab.reshape(Bn, bands, L)          # contiguous -> free

    pan_slab = PAN.reshape(Bn, 1, L)
    r_col = params["r_w"].reshape(bands, 1)   # R_T(R(.)) is rank-1: r r^T
    den_w = params["den_w"]

    # ---- bicubic initialization ----
    # TODO(synk): torch bicubic uses a=-0.75; jax.image cubic uses Keys a=-0.5.
    X0 = jax.image.resize(HS, (Bn, bands, S, S), method="bicubic")

    def stage(xpk_slab, layer):
        xpk4 = xpk_slab.reshape(Bn, bands, S, S)
        if layer == 1:
            xpk4 = use_dsp(xpk4, jax.lax.stop_gradient(DSP_T))
            xpk_slab = xpk4.reshape(Bn, bands, L)
        # warp (XLA gather) -> one Pallas MXU matmul vs shared E; the 0.25 from
        # B(B_T(.)) is folded into the stage kernel's eta coefficient.
        xw = use_dsp(xpk4, jax.lax.stop_gradient(DSP))
        xp1m_slab = mm_shared_rhs(xw.reshape(Bn, bands * S, S), E)
        xp1m_slab = xp1m_slab.reshape(Bn, bands, L)
        return fused_stage(xpk_slab, hsp_slab, xp1m_slab, pan_slab,
                           r_col, den_w, params["eta"][layer - 1])

    x1 = stage(X0.reshape(Bn, bands, L), 1)   # FusionM layer 1 + Denoise
    x2 = stage(x1, 2)                          # FusionM layer 2 + Denoise
    x3 = stage(x2, 3)                          # FusionM layer 3 + Denoise
    return x3.reshape(Bn, bands, S, S), DSP, I


def init_params(key, bands):
    k1, k2, k3, k4 = jax.random.split(key, 4)
    return {
        "conv_p": jax.random.normal(k1, (1, bands), jnp.float32) * 0.3,
        "r_w":    jax.random.normal(k2, (1, bands), jnp.float32) * 0.3,
        "reg_w":  jax.random.normal(k3, (2, 2), jnp.float32) * 0.05,
        "den_w":  jax.random.normal(k4, (bands, bands), jnp.float32) * 0.05,
        "eta":    jnp.full((4,), 2.0, jnp.float32),  # one eta per FusionM (F4 unused)
    }


if __name__ == "__main__":
    key = jax.random.PRNGKey(0)
    batch, bands, size_E = 2, 4, 16
    h = size_E // 2
    ks = jax.random.split(key, 5)

    PAN = jax.random.normal(ks[0], (batch, 1, size_E, size_E), jnp.float32)
    PAN_reg = jax.random.normal(ks[1], (batch, 1, size_E, size_E), jnp.float32)
    HS = jax.random.normal(ks[2], (batch, bands, h, h), jnp.float32)
    DSP_T = jax.random.normal(ks[3], (batch, 2, size_E, size_E), jnp.float32) * 0.5

    params = init_params(ks[4], bands)

    fwd = jax.jit(lambda pan, pan_reg, hs, dsp_t:
                  fandd_h_forward(params, pan, pan_reg, hs, dsp_t))
    X3, DSP1, I = fwd(PAN, PAN_reg, HS, DSP_T)
    jax.block_until_ready((X3, DSP1, I))

    assert X3.shape == (batch, bands, size_E, size_E)
    assert DSP1.shape == (batch, 2, size_E, size_E)
    assert I.shape == (batch, 1, size_E, size_E)
    assert bool(jnp.isfinite(X3).all())
    print("KERNEL_OK")
</pallas_src>

<mosaic_0001>
module attributes {stable_mosaic.version = 11 : i64} {
  func.func @_cmix_kernel(%arg0: i32, %arg1: memref<1x4xf32, #tpu.memory_space<smem>>, %arg2: memref<4x128xf32, #tpu.memory_space<vmem>>, %arg3: memref<1x128xf32, #tpu.memory_space<vmem>>) attributes {dimension_semantics = [#tpu.dimension_semantics<parallel>], iteration_bounds = array<i64: 1>, scalar_prefetch = 0 : i64, scratch_operands = 0 : i64, tpu.core_type = #tpu.core_type<tc>, window_params = [{transform_indices = @transform_0, window_bounds = array<i64: 1, 4>}, {transform_indices = @transform_1, window_bounds = array<i64: 4, 128>}, {transform_indices = @transform_2, window_bounds = array<i64: 1, 128>}]} {
    %c0 = arith.constant 0 : index
    %c0_0 = arith.constant 0 : index
    %0 = memref.load %arg1[%c0, %c0_0] : memref<1x4xf32, #tpu.memory_space<smem>>
    %c0_1 = arith.constant 0 : index
    %c0_2 = arith.constant 0 : index
    %1 = vector.load %arg2[%c0_1, %c0_2] : memref<4x128xf32, #tpu.memory_space<vmem>>, vector<1x128xf32>
    %2 = vector.broadcast %0 : f32 to vector<1x128xf32>
    %3 = arith.mulf %2, %1 : vector<1x128xf32>
    %c0_3 = arith.constant 0 : index
    %c1 = arith.constant 1 : index
    %4 = memref.load %arg1[%c0_3, %c1] : memref<1x4xf32, #tpu.memory_space<smem>>
    %c1_4 = arith.constant 1 : index
    %c0_5 = arith.constant 0 : index
    %5 = vector.load %arg2[%c1_4, %c0_5] : memref<4x128xf32, #tpu.memory_space<vmem>>, vector<1x128xf32>
    %6 = vector.broadcast %4 : f32 to vector<1x128xf32>
    %7 = arith.mulf %6, %5 : vector<1x128xf32>
    %8 = arith.addf %3, %7 : vector<1x128xf32>
    %c0_6 = arith.constant 0 : index
    %c2 = arith.constant 2 : index
    %9 = memref.load %arg1[%c0_6, %c2] : memref<1x4xf32, #tpu.memory_space<smem>>
    %c2_7 = arith.constant 2 : index
    %c0_8 = arith.constant 0 : index
    %10 = vector.load %arg2[%c2_7, %c0_8] : memref<4x128xf32, #tpu.memory_space<vmem>>, vector<1x128xf32>
    %11 = vector.broadcast %9 : f32 to vector<1x128xf32>
    %12 = arith.mulf %11, %10 : vector<1x128xf32>
    %13 = arith.addf %8, %12 : vector<1x128xf32>
    %c0_9 = arith.constant 0 : index
    %c3 = arith.constant 3 : index
    %14 = memref.load %arg1[%c0_9, %c3] : memref<1x4xf32, #tpu.memory_space<smem>>
    %c3_10 = arith.constant 3 : index
    %c0_11 = arith.constant 0 : index
    %15 = vector.load %arg2[%c3_10, %c0_11] : memref<4x128xf32, #tpu.memory_space<vmem>>, vector<1x128xf32>
    %16 = vector.broadcast %14 : f32 to vector<1x128xf32>
    %17 = arith.mulf %16, %15 : vector<1x128xf32>
    %18 = arith.addf %13, %17 : vector<1x128xf32>
    %c0_12 = arith.constant 0 : index
    %c0_13 = arith.constant 0 : index
    %19 = vector.load %arg3[%c0_12, %c0_13] : memref<1x128xf32, #tpu.memory_space<vmem>>, vector<1x128xf32>
    tpu.vector_store %arg3[%c0_12, %c0_13], %18 {strides = array<i32>} : memref<1x128xf32, #tpu.memory_space<vmem>>, vector<1x128xf32>,
    return
  }
  func.func @transform_0(%arg0: i32) -> (i32, i32) {
    %c0_i32 = arith.constant 0 : i32
    %c0_i32_0 = arith.constant 0 : i32
    %c0_i32_1 = arith.constant 0 : i32
    return %c0_i32, %c0_i32_0 : i32, i32
  }
  func.func @transform_1(%arg0: i32) -> (i32, i32) {
    %c0_i32 = arith.constant 0 : i32
    %c0_i32_0 = arith.constant 0 : i32
    return %c0_i32, %arg0 : i32, i32
  }
  func.func @transform_2(%arg0: i32) -> (i32, i32) {
    %c0_i32 = arith.constant 0 : i32
    %c0_i32_0 = arith.constant 0 : i32
    return %c0_i32, %arg0 : i32, i32
  }
}

module attributes {stable_mosaic.version = 11 : i64} {
  func.func @_cmix_kernel(%arg0: i32, %arg1: memref<2x2xf32, #tpu.memory_space<smem>>, %arg2: memref<2x512xf32, #tpu.memory_space<vmem>>, %arg3: memref<2x512xf32, #tpu.memory_space<vmem>>) attributes {dimension_semantics = [#tpu.dimension_semantics<parallel>], iteration_bounds = array<i64: 1>, scalar_prefetch = 0 : i64, scratch_operands = 0 : i64, tpu.core_type = #tpu.core_type<tc>, window_params = [{transform_indices = @transform_0, window_bounds = array<i64: 2, 2>}, {transform_indices = @transform_1, window_bounds = array<i64: 2, 512>}, {transform_indices = @transform_2, window_bounds = array<i64: 2, 512>}]} {
    %c0 = arith.constant 0 : index
    %c0_0 = arith.constant 0 : index
    %0 = memref.load %arg1[%c0, %c0_0] : memref<2x2xf32, #tpu.memory_space<smem>>
    %c0_1 = arith.constant 0 : index
    %c0_2 = arith.constant 0 : index
    %1 = vector.load %arg2[%c0_1, %c0_2] : memref<2x512xf32, #tpu.memory_space<vmem>>, vector<1x512xf32>
    %2 = vector.broadcast %0 : f32 to vector<1x512xf32>
    %3 = arith.mulf %2, %1 : vector<1x512xf32>
    %c0_3 = arith.constant 0 : index
    %c1 = arith.constant 1 : index
    %4 = memref.load %arg1[%c0_3, %c1] : memref<2x2xf32, #tpu.memory_space<smem>>
    %c1_4 = arith.constant 1 : index
    %c0_5 = arith.constant 0 : index
    %5 = vector.load %arg2[%c1_4, %c0_5] : memref<2x512xf32, #tpu.memory_space<vmem>>, vector<1x512xf32>
    %6 = vector.broadcast %4 : f32 to vector<1x512xf32>
    %7 = arith.mulf %6, %5 : vector<1x512xf32>
    %8 = arith.addf %3, %7 : vector<1x512xf32>
    %c0_6 = arith.constant 0 : index
    %c0_7 = arith.constant 0 : index
    %9 = vector.load %arg3[%c0_6, %c0_7] : memref<2x512xf32, #tpu.memory_space<vmem>>, vector<1x512xf32>
    tpu.vector_store %arg3[%c0_6, %c0_7], %8 {strides = array<i32>} : memref<2x512xf32, #tpu.memory_space<vmem>>, vector<1x512xf32>,
    %c1_8 = arith.constant 1 : index
    %c0_9 = arith.constant 0 : index
    %10 = memref.load %arg1[%c1_8, %c0_9] : memref<2x2xf32, #tpu.memory_space<smem>>
    %c0_10 = arith.constant 0 : index
    %c0_11 = arith.constant 0 : index
    %11 = vector.load %arg2[%c0_10, %c0_11] : memref<2x512xf32, #tpu.memory_space<vmem>>, vector<1x512xf32>
    %12 = vector.broadcast %10 : f32 to vector<1x512xf32>
    %13 = arith.mulf %12, %11 : vector<1x512xf32>
    %c1_12 = arith.constant 1 : index
    %c1_13 = arith.constant 1 : index
    %14 = memref.load %arg1[%c1_12, %c1_13] : memref<2x2xf32, #tpu.memory_space<smem>>
    %c1_14 = arith.constant 1 : index
    %c0_15 = arith.constant 0 : index
    %15 = vector.load %arg2[%c1_14, %c0_15] : memref<2x512xf32, #tpu.memory_space<vmem>>, vector<1x512xf32>
    %16 = vector.broadcast %14 : f32 to vector<1x512xf32>
    %17 = arith.mulf %16, %15 : vector<1x512xf32>
    %18 = arith.addf %13, %17 : vector<1x512xf32>
    %c1_16 = arith.constant 1 : index
    %c0_17 = arith.constant 0 : index
    %19 = vector.load %arg3[%c1_16, %c0_17] : memref<2x512xf32, #tpu.memory_space<vmem>>, vector<1x512xf32>
    tpu.vector_store %arg3[%c1_16, %c0_17], %18 {strides = array<i32>} : memref<2x512xf32, #tpu.memory_space<vmem>>, vector<1x512xf32>,
    return
  }
  func.func @transform_0(%arg0: i32) -> (i32, i32) {
    %c0_i32 = arith.constant 0 : i32
    %c0_i32_0 = arith.constant 0 : i32
    %c0_i32_1 = arith.constant 0 : i32
    return %c0_i32, %c0_i32_0 : i32, i32
  }
  func.func @transform_1(%arg0: i32) -> (i32, i32) {
    %c0_i32 = arith.constant 0 : i32
    %c0_i32_0 = arith.constant 0 : i32
    return %c0_i32, %arg0 : i32, i32
  }
  func.func @transform_2(%arg0: i32) -> (i32, i32) {
    %c0_i32 = arith.constant 0 : i32
    %c0_i32_0 = arith.constant 0 : i32
    return %c0_i32, %arg0 : i32, i32
  }
}

module attributes {stable_mosaic.version = 11 : i64} {
  func.func @_mm_shared_rhs_kernel(%arg0: i32, %arg1: memref<1x64x16xf32, #tpu.memory_space<vmem>>, %arg2: memref<1x16x16xf32, #tpu.memory_space<vmem>>, %arg3: memref<1x64x16xf32, #tpu.memory_space<vmem>>) attributes {dimension_semantics = [#tpu.dimension_semantics<parallel>], iteration_bounds = array<i64: 2>, scalar_prefetch = 0 : i64, scratch_operands = 0 : i64, tpu.core_type = #tpu.core_type<tc>, window_params = [{transform_indices = @transform_0, window_bounds = array<i64: 1, 64, 16>}, {transform_indices = @transform_1, window_bounds = array<i64: 1, 16, 16>}, {transform_indices = @transform_2, window_bounds = array<i64: 1, 64, 16>}]} {
    %c0 = arith.constant 0 : index
    %c0_0 = arith.constant 0 : index
    %c0_1 = arith.constant 0 : index
    %0 = vector.load %arg1[%c0, %c0_0, %c0_1] : memref<1x64x16xf32, #tpu.memory_space<vmem>>, vector<1x64x16xf32>
    %1 = vector.shape_cast %0 : vector<1x64x16xf32> to vector<64x16xf32>
    %c0_2 = arith.constant 0 : index
    %c0_3 = arith.constant 0 : index
    %c0_4 = arith.constant 0 : index
    %2 = vector.load %arg2[%c0_2, %c0_3, %c0_4] : memref<1x16x16xf32, #tpu.memory_space<vmem>>, vector<1x16x16xf32>
    %3 = vector.shape_cast %2 : vector<1x16x16xf32> to vector<16x16xf32>
    %cst = arith.constant dense<0.000000e+00> : vector<64x16xf32>
    %4 = tpu.matmul %1, %3, %cst {dimension_numbers = #tpu.dot_dimension_numbers<[1], [0], [0], [1], [0, 0, 1, 1], [], []>} : vector<64x16xf32>, vector<16x16xf32>, vector<64x16xf32> -> vector<64x16xf32>
    %c0_5 = arith.constant 0 : index
    %c0_6 = arith.constant 0 : index
    %c0_7 = arith.constant 0 : index
    %5 = vector.load %arg3[%c0_5, %c0_6, %c0_7] : memref<1x64x16xf32, #tpu.memory_space<vmem>>, vector<1x64x16xf32>
    %6 = vector.shape_cast %5 : vector<1x64x16xf32> to vector<64x16xf32>
    %7 = vector.shape_cast %4 : vector<64x16xf32> to vector<1x64x16xf32>
    tpu.vector_store %arg3[%c0_5, %c0_6, %c0_7], %7 {strides = array<i32>} : memref<1x64x16xf32, #tpu.memory_space<vmem>>, vector<1x64x16xf32>,
    return
  }
  func.func @transform_0(%arg0: i32) -> (i32, i32, i32) {
    %c0_i32 = arith.constant 0 : i32
    %c0_i32_0 = arith.constant 0 : i32
    %c0_i32_1 = arith.constant 0 : i32
    return %arg0, %c0_i32, %c0_i32_0 : i32, i32, i32
  }
  func.func @transform_1(%arg0: i32) -> (i32, i32, i32) {
    %c0_i32 = arith.constant 0 : i32
    %c0_i32_0 = arith.constant 0 : i32
    %c0_i32_1 = arith.constant 0 : i32
    return %arg0, %c0_i32, %c0_i32_0 : i32, i32, i32
  }
  func.func @transform_2(%arg0: i32) -> (i32, i32, i32) {
    %c0_i32 = arith.constant 0 : i32
    %c0_i32_0 = arith.constant 0 : i32
    %c0_i32_1 = arith.constant 0 : i32
    return %arg0, %c0_i32, %c0_i32_0 : i32, i32, i32
  }
}

module attributes {stable_mosaic.version = 11 : i64} {
  func.func @_stage_kernel(%arg0: i32, %arg1: memref<1xf32, #tpu.memory_space<smem>>, %arg2: memref<1x4x256xf32, #tpu.memory_space<vmem>>, %arg3: memref<1x4x256xf32, #tpu.memory_space<vmem>>, %arg4: memref<1x4x256xf32, #tpu.memory_space<vmem>>, %arg5: memref<1x1x256xf32, #tpu.memory_space<vmem>>, %arg6: memref<4x1xf32, #tpu.memory_space<vmem>>, %arg7: memref<4x4xf32, #tpu.memory_space<vmem>>, %arg8: memref<1x4x256xf32, #tpu.memory_space<vmem>>) attributes {dimension_semantics = [#tpu.dimension_semantics<parallel>], iteration_bounds = array<i64: 2>, scalar_prefetch = 0 : i64, scratch_operands = 0 : i64, tpu.core_type = #tpu.core_type<tc>, window_params = [{transform_indices = @transform_0, window_bounds = array<i64: 1>}, {transform_indices = @transform_1, window_bounds = array<i64: 1, 4, 256>}, {transform_indices = @transform_2, window_bounds = array<i64: 1, 4, 256>}, {transform_indices = @transform_3, window_bounds = array<i64: 1, 4, 256>}, {transform_indices = @transform_4, window_bounds = array<i64: 1, 1, 256>}, {pipeline_mode = #tpu.pipeline_mode<synchronous>, transform_indices = @transform_5, window_bounds = array<i64: 4, 1>}, {pipeline_mode = #tpu.pipeline_mode<synchronous>, transform_indices = @transform_6, window_bounds = array<i64: 4, 4>}, {transform_indices = @transform_7, window_bounds = array<i64: 1, 4, 256>}]} {
    %c0 = arith.constant 0 : index
    %0 = memref.load %arg1[%c0] : memref<1xf32, #tpu.memory_space<smem>>
    %c0_0 = arith.constant 0 : index
    %c0_1 = arith.constant 0 : index
    %c0_2 = arith.constant 0 : index
    %1 = vector.load %arg2[%c0_0, %c0_1, %c0_2] : memref<1x4x256xf32, #tpu.memory_space<vmem>>, vector<1x4x256xf32>
    %2 = vector.shape_cast %1 : vector<1x4x256xf32> to vector<4x256xf32>
    %c0_3 = arith.constant 0 : index
    %c0_4 = arith.constant 0 : index
    %3 = vector.load %arg6[%c0_3, %c0_4] : memref<4x1xf32, #tpu.memory_space<vmem>>, vector<4x1xf32>
    %4 = vector.broadcast %3 : vector<4x1xf32> to vector<4x256xf32>
    %5 = arith.mulf %4, %2 : vector<4x256xf32>
    %cst = arith.constant dense<0.000000e+00> : vector<256xf32>
    %6 = vector.multi_reduction <add>, %5, %cst [0] : vector<4x256xf32> to vector<256xf32>
    %7 = vector.shape_cast %6 : vector<256xf32> to vector<1x256xf32>
    %c0_5 = arith.constant 0 : index
    %c0_6 = arith.constant 0 : index
    %c0_7 = arith.constant 0 : index
    %8 = vector.load %arg5[%c0_5, %c0_6, %c0_7] : memref<1x1x256xf32, #tpu.memory_space<vmem>>, vector<1x1x256xf32>
    %9 = vector.shape_cast %8 : vector<1x1x256xf32> to vector<1x256xf32>
    %10 = arith.subf %7, %9 : vector<1x256xf32>
    %11 = vector.shape_cast %10 : vector<1x256xf32> to vector<1x256xf32>
    %12 = vector.broadcast %11 : vector<1x256xf32> to vector<4x256xf32>
    %13 = vector.broadcast %3 : vector<4x1xf32> to vector<4x256xf32>
    %14 = arith.mulf %13, %12 : vector<4x256xf32>
    %c0_8 = arith.constant 0 : index
    %c0_9 = arith.constant 0 : index
    %c0_10 = arith.constant 0 : index
    %15 = vector.load %arg3[%c0_8, %c0_9, %c0_10] : memref<1x4x256xf32, #tpu.memory_space<vmem>>, vector<1x4x256xf32>
    %16 = vector.shape_cast %15 : vector<1x4x256xf32> to vector<4x256xf32>
    %17 = arith.subf %16, %14 : vector<4x256xf32>
    %18 = vector.broadcast %0 : f32 to vector<4x256xf32>
    %19 = arith.mulf %18, %17 : vector<4x256xf32>
    %20 = arith.addf %2, %19 : vector<4x256xf32>
    %cst_11 = arith.constant 2.500000e-01 : f32
    %21 = arith.mulf %cst_11, %0 : f32
    %c0_12 = arith.constant 0 : index
    %c0_13 = arith.constant 0 : index
    %c0_14 = arith.constant 0 : index
    %22 = vector.load %arg4[%c0_12, %c0_13, %c0_14] : memref<1x4x256xf32, #tpu.memory_space<vmem>>, vector<1x4x256xf32>
    %23 = vector.shape_cast %22 : vector<1x4x256xf32> to vector<4x256xf32>
    %24 = vector.broadcast %21 : f32 to vector<4x256xf32>
    %25 = arith.mulf %24, %23 : vector<4x256xf32>
    %26 = arith.subf %20, %25 : vector<4x256xf32>
    %c0_15 = arith.constant 0 : index
    %c0_16 = arith.constant 0 : index
    %27 = vector.load %arg7[%c0_15, %c0_16] : memref<4x4xf32, #tpu.memory_space<vmem>>, vector<4x4xf32>
    %cst_17 = arith.constant dense<0.000000e+00> : vector<4x256xf32>
    %28 = tpu.matmul %27, %26, %cst_17 {dimension_numbers = #tpu.dot_dimension_numbers<[1], [0], [0], [1], [0, 0, 1, 1], [], []>} : vector<4x4xf32>, vector<4x256xf32>, vector<4x256xf32> -> vector<4x256xf32>
    %29 = arith.addf %26, %28 : vector<4x256xf32>
    %c0_18 = arith.constant 0 : index
    %c0_19 = arith.constant 0 : index
    %c0_20 = arith.constant 0 : index
    %30 = vector.load %arg8[%c0_18, %c0_19, %c0_20] : memref<1x4x256xf32, #tpu.memory_space<vmem>>, vector<1x4x256xf32>
    %31 = vector.shape_cast %30 : vector<1x4x256xf32> to vector<4x256xf32>
    %32 = vector.shape_cast %29 : vector<4x256xf32> to vector<1x4x256xf32>
    tpu.vector_store %arg8[%c0_18, %c0_19, %c0_20], %32 {strides = array<i32>} : memref<1x4x256xf32, #tpu.memory_space<vmem>>, vector<1x4x256xf32>,
    return
  }
  func.func @transform_0(%arg0: i32) -> i32 {
    %c0_i32 = arith.constant 0 : i32
    %c0_i32_0 = arith.constant 0 : i32
    return %c0_i32 : i32
  }
  func.func @transform_1(%arg0: i32) -> (i32, i32, i32) {
    %c0_i32 = arith.constant 0 : i32
    %c0_i32_0 = arith.constant 0 : i32
    %c0_i32_1 = arith.constant 0 : i32
    return %arg0, %c0_i32, %c0_i32_0 : i32, i32, i32
  }
  func.func @transform_2(%arg0: i32) -> (i32, i32, i32) {
    %c0_i32 = arith.constant 0 : i32
    %c0_i32_0 = arith.constant 0 : i32
    %c0_i32_1 = arith.constant 0 : i32
    return %arg0, %c0_i32, %c0_i32_0 : i32, i32, i32
  }
  func.func @transform_3(%arg0: i32) -> (i32, i32, i32) {
    %c0_i32 = arith.constant 0 : i32
    %c0_i32_0 = arith.constant 0 : i32
    %c0_i32_1 = arith.constant 0 : i32
    return %arg0, %c0_i32, %c0_i32_0 : i32, i32, i32
  }
  func.func @transform_4(%arg0: i32) -> (i32, i32, i32) {
    %c0_i32 = arith.constant 0 : i32
    %c0_i32_0 = arith.constant 0 : i32
    %c0_i32_1 = arith.constant 0 : i32
    return %arg0, %c0_i32, %c0_i32_0 : i32, i32, i32
  }
  func.func @transform_5(%arg0: i32) -> (i32, i32) {
    %c0_i32 = arith.constant 0 : i32
    %c0_i32_0 = arith.constant 0 : i32
    %c0_i32_1 = arith.constant 0 : i32
    return %c0_i32, %c0_i32_0 : i32, i32
  }
  func.func @transform_6(%arg0: i32) -> (i32, i32) {
    %c0_i32 = arith.constant 0 : i32
    %c0_i32_0 = arith.constant 0 : i32
    %c0_i32_1 = arith.constant 0 : i32
    return %c0_i32, %c0_i32_0 : i32, i32
  }
  func.func @transform_7(%arg0: i32) -> (i32, i32, i32) {
    %c0_i32 = arith.constant 0 : i32
    %c0_i32_0 = arith.constant 0 : i32
    %c0_i32_1 = arith.constant 0 : i32
    return %arg0, %c0_i32, %c0_i32_0 : i32, i32, i32
  }
}

</mosaic_0001>

<bundles_post_ra>
// kernel: _lambda_.9
= control target key start
LH: loop header
LB: loop body
LE: loop exit
PB: predicated region body
PF: predicated region fallthrough
CT: control target
= control target key end

     0   :  { %7 = vsyncpa [#allocation3], 0  ;;  %s67_s12 = smov [#allocation2]   ;;  %s101_s0 = inlined_call_operand.vmem [shape: f32[1,4], index: 0, kind: input, shape index: {}]   ;;  %s102_s1 = inlined_call_operand.vmem [shape: f32[4,128], index: 1, kind: input, shape index: {}]   ;;  %s103_s2 = inlined_call_operand.vmem [shape: f32[1,128], index: 2, kind: output, shape index: {}]  }
   0x1   :  { %s13_s11 = sshll.u32 %s101_s0, 4  ;;  %s14_s11 = int_to_ptr.vmem [resolvable:$true] %s13_s11 }
   0x2   :  { %16 = dma.vmem_to_smem %s14_s11, 16, %s67_s12, [#allocation3]  }
   0x3   :  { %65 = dma.done.wait [#allocation3], 16  }
   0x4   :  { %66 = vsyncadd [#allocation3], 4294967280 }
   0x5   :  { %23 = sfence }
   0x6   :  { %s24_s13 = sld [smem:[#allocation2]]  ;;  %v25_v0 = vld [vmem:[%s102_s1] sm:$0x1]  ;;  %v29_v1 = vld [vmem:[%s102_s1 + $0x1] sm:$0x1] }
   0x7   :  { %s49_s14 = sld [smem:[#allocation2 + $0x1]]  ;;  %v34_v3 = vld [vmem:[%s102_s1 + $0x2] sm:$0x1]  ;;  %v39_v6 = vld [vmem:[%s102_s1 + $0x3] sm:$0x1] }
   0x8   :  { %s50_s15 = sld [smem:[#allocation2 + $0x2]] }
   0x9   :  { %s51_s16 = sld [smem:[#allocation2 + $0x3]] }
   0xc   :  { %v26_v2 = vstv %s24_s13 }
   0xd   :  { %v27_v4 = vmul.f32 %v26_v2, %v25_v0  ;;  %v30_v5 = vstv %s49_s14 }
   0xe   :  { %v31_v7 = vmul.f32 %v30_v5, %v29_v1  ;;  %v35_v8 = vstv %s50_s15 }
   0xf   :  { %v36_v9 = vmul.f32 %v35_v8, %v34_v3  ;;  %v40_v10 = vstv %s51_s16 }
  0x10   :  { %v32_v11 = vadd.f32 %v31_v7, %v27_v4  ;;  %v41_v12 = vmul.f32 %v40_v10, %v39_v6 }
  0x12   :  { %v37_v13 = vadd.f32 %v36_v9, %v32_v11 }
  0x14   :  { %v42_v14 = vadd.f32 %v41_v12, %v37_v13 }
  0x16   :  { %43 = vst [vmem:[%s103_s2] sm:$0x1] %v42_v14 }
  0x17   :  { %48 = vsyncpa [#allocation3], 1 }

// kernel: _lambda_.10
= control target key start
LH: loop header
LB: loop body
LE: loop exit
PB: predicated region body
PF: predicated region fallthrough
CT: control target
= control target key end

     0   :  { %7 = vsyncpa [#allocation3], 0  ;;  %s76_s12 = smov [#allocation2]   ;;  %s113_s0 = inlined_call_operand.vmem [shape: f32[2,2], index: 0, kind: input, shape index: {}]   ;;  %s114_s1 = inlined_call_operand.vmem [shape: f32[2,512], index: 1, kind: input, shape index: {}]   ;;  %s115_s2 = inlined_call_operand.vmem [shape: f32[2,512], index: 2, kind: output, shape index: {}]  }
   0x1   :  { %s13_s11 = sshll.u32 %s113_s0, 4  ;;  %s14_s11 = int_to_ptr.vmem [resolvable:$true] %s13_s11 }
   0x2   :  { %16 = dma.vmem_to_smem %s14_s11, 32, %s76_s12, [#allocation3]  }
   0x3   :  { %74 = dma.done.wait [#allocation3], 32  }
   0x4   :  { %75 = vsyncadd [#allocation3], 4294967264 }
   0x5   :  { %23 = sfence }
   0x6   :  { %s24_s13 = sld [smem:[#allocation2]]  ;;  %v25_v0 = vld [vmem:[%s114_s1] ss:$2 sm:$0xf]  ;;  %v34_v2 = vlaneseq }
   0x7   :  { %s55_s14 = sld [smem:[#allocation2 + $0x1]]  ;;  %v56_v1 = vld [vmem:[%s114_s1 + $0x1] ss:$2 sm:$0xf] }
   0x8   :  { %s57_s15 = sld [smem:[#allocation2 + $0x80]]  ;;  %v40_v4 = vld [vmem:[%s114_s1] ss:$2 sm:$0xf]  ;;  %vm36_vm0 = vcmp.lt.s32.totalorder %v34_v2, 512 }
   0x9   :  { %s58_s16 = sld [smem:[#allocation2 + $0x81]]  ;;  %v59_v7 = vld [vmem:[%s114_s1 + $0x1] ss:$2 sm:$0xf] }
   0xc   :  { %v26_v3 = vstv %s24_s13 }
   0xd   :  { %v27_v5 = vmul.f32 %v26_v3, %v25_v0  ;;  %v31_v6 = vstv %s55_s14 }
   0xe   :  { %v32_v8 = vmul.f32 %v56_v1, %v31_v6  ;;  %v41_v9 = vstv %s57_s15 }
   0xf   :  { %v42_v10 = vmul.f32 %v41_v9, %v40_v4  ;;  %v45_v11 = vstv %s58_s16 }
  0x10   :  { %v33_v12 = vadd.f32 %v32_v8, %v27_v5  ;;  %v46_v13 = vmul.f32 %v59_v7, %v45_v11 }
  0x12   :  { %38 = vst.msk [vmem:[%s115_s2] ss:$2 sm:$0xf] %vm36_vm0, %v33_v12  ;;  %v47_v14 = vadd.f32 %v46_v13, %v42_v10 }
  0x14   :  { %60 = vst.msk [vmem:[%s115_s2 + $0x1] ss:$2 sm:$0xf] %vm36_vm0, %v47_v14 }
  0x15   :  { %54 = vsyncpa [#allocation3], 1 }

// kernel: _lambda_.12
= control target key start
LH: loop header
LB: loop body
LE: loop exit
PB: predicated region body
PF: predicated region fallthrough
CT: control target
= control target key end

     0   :  { %s376_s9 = smov 0   ;;  %s420_s0 = inlined_call_operand.vmem [shape: f32[2,64,16], index: 0, kind: input, shape index: {}]   ;;  %s421_s1 = inlined_call_operand.vmem [shape: f32[2,16,16], index: 1, kind: input, shape index: {}]   ;;  %s422_s2 = inlined_call_operand.vmem [shape: f32[2,64,16], index: 2, kind: output, shape index: {}]  }
   0x1 LB: > { %s315_s10 = sadd.s32 4294967295, %s359_s9   ;;  %p319_p0 = scmp.ge.s32.totalorder %s359_s9, 1  ;;  %s359_s9 = sphi %s376_s9, %s12_s9  }
   0x2   : > { %p122_p1 = scmp.lt.s32.totalorder %s359_s9, 3 }
   0x4   : > { %p123_p2 = pnand %p319_p0, %p122_p1 }
   0x5   : > { %p149_p3 = scmp.lt.s32.totalorder (!%p123_p2), %s315_s10, 1 }
   0x6   : > { %126 = sbr.rel (%p123_p2) target bundleno = 160 (0xa0), region = 28 }
   0xb   : > { %s424_s10 = smov (!%p149_p3, %s315_s10), 1  ;;  %vm174_vm0 = vcmask 130048  }
   0xc   : > { %s336_s11 = sshll.u32 %s424_s10, 6  ;;  %s337_s12 = sshll.u32 %s424_s10, 4 }
   0xd   : > { %s153_s15 = scalar_lea.vmem %s420_s0, %s336_s11  ;;  %s158_s18 = scalar_lea.vmem %s421_s1, %s337_s12 }
   0xe   : > { %v173_v0 = vld [vmem:[%s158_s18 + $0x8] sm:$0xff]  ;;  %v172_v1 = vld [vmem:[%s158_s18] sm:$0xff]  ;;  %v170_v3 = vld [vmem:[%s153_s15 + $0x30] sm:$0xff]  ;;  %s163_s21 = scalar_lea.vmem %s422_s2, %s336_s11 }
   0xf   : > { %340 = vmatpush.msra.mxu2 %v173_v0  ;;  %341 = vmatpush.msra.mxu3 %v173_v0  ;;  %v168_v2 = vld [vmem:[%s153_s15 + $0x20] sm:$0xff]  ;;  %v166_v5 = vld [vmem:[%s153_s15 + $0x10] sm:$0xff]  ;;  %v169_v6 = vld [vmem:[%s153_s15 + $0x28] sm:$0xff] }
  0x10   : > { %213 = vmatpush.msra.mxu0 %v173_v0  ;;  %339 = vmatpush.msra.mxu1 %v173_v0  ;;  %v164_v4 = vld [vmem:[%s153_s15] sm:$0xff]  ;;  %v171_v7 = vld [vmem:[%s153_s15 + $0x38] sm:$0xff]  ;;  %v165_v8 = vld [vmem:[%s153_s15 + $0x8] sm:$0xff] }
  0x11   : > { %343 = vmatpush.msra.mxu2 %v172_v1  ;;  %344 = vmatpush.msra.mxu3 %v172_v1  ;;  %v167_v9 = vld [vmem:[%s153_s15 + $0x18] sm:$0xff] }
  0x12   : > { %330 = vmatmul.msk.f32.vlgmr.msra.gmra.mxu2 %vm174_vm0, %v168_v2  ;;  %332 = vmatmul.msk.f32.vlgmr.msra.gmra.mxu3 %vm174_vm0, %v170_v3 }
  0x13   : > { %214 = vmatpush.msra.mxu0 %v172_v1  ;;  %342 = vmatpush.msra.mxu1 %v172_v1 }
  0x14   : > { %326 = vmatmul.msk.f32.vlgmr.msra.gmra.mxu0 %vm174_vm0, %v164_v4  ;;  %328 = vmatmul.msk.f32.vlgmr.msra.gmra.mxu1 %vm174_vm0, %v166_v5 }
  0x1a   : > { %331 = vmatmul.msk.f32.gmra.mxu2 %vm174_vm0, %v169_v6  ;;  %333 = vmatmul.msk.f32.gmra.mxu3 %vm174_vm0, %v171_v7 }
  0x1c   : > { %327 = vmatmul.msk.f32.gmra.mxu0 %vm174_vm0, %v165_v8  ;;  %329 = vmatmul.msk.f32.gmra.mxu1 %vm174_vm0, %v167_v9 }
  0x91   : > { %v216_v10 = vpop.f32.mrf.mxu0  ;;  %v222_v11 = vpop.f32.mrf.mxu1 }
  0x92   : > { %240 = vst.msk [vmem:[%s163_s21] sm:$0xff] %vm174_vm0, %v216_v10 }
  0x93   : > { %242 = vst.msk [vmem:[%s163_s21 + $0x10] sm:$0xff] %vm174_vm0, %v222_v11 }
  0x95   : > { %v228_v12 = vpop.f32.mrf.mxu2  ;;  %v234_v13 = vpop.f32.mrf.mxu3 }
  0x96   : > { %244 = vst.msk [vmem:[%s163_s21 + $0x20] sm:$0xff] %vm174_vm0, %v228_v12 }
  0x97   : > { %246 = vst.msk [vmem:[%s163_s21 + $0x30] sm:$0xff] %vm174_vm0, %v234_v13 }
  0x99   : > { %v219_v14 = vpop.f32.mrf.mxu0  ;;  %v225_v15 = vpop.f32.mrf.mxu1 }
  0x9a   : > { %241 = vst.msk [vmem:[%s163_s21 + $0x8] sm:$0xff] %vm174_vm0, %v219_v14 }
  0x9b   : > { %243 = vst.msk [vmem:[%s163_s21 + $0x18] sm:$0xff] %vm174_vm0, %v225_v15 }
  0x9d   : > { %v231_v16 = vpop.f32.mrf.mxu2  ;;  %v237_v17 = vpop.f32.mrf.mxu3 }
  0x9e   : > { %245 = vst.msk [vmem:[%s163_s21 + $0x28] sm:$0xff] %vm174_vm0, %v231_v16 }
  0x9f   : > { %247 = vst.msk [vmem:[%s163_s21 + $0x38] sm:$0xff] %vm174_vm0, %v237_v17 }
  0xa0 PF: > { %s12_s9 = sadd.s32 1, %s359_s9  }
  0xa1   : > { %p9_p4 = scmp.ge.s32.totalorder %s12_s9, 4  }
  0xa3   :  { %11 = sbr.rel (!%p9_p4) target bundleno = 1 (0x1), region = 61 }

// kernel: _lambda_.13
= control target key start
LH: loop header
LB: loop body
LE: loop exit
PB: predicated region body
PF: predicated region fallthrough
CT: control target
= control target key end

     0   :  { %s632_s26 = smov 0   ;;  %s676_s0 = inlined_call_operand.<no memory space> [shape: f32[1], index: 0, kind: input, shape index: {}]   ;;  %s677_s1 = inlined_call_operand.vmem [shape: f32[2,4,256], index: 1, kind: input, shape index: {}]   ;;  %s678_s2 = inlined_call_operand.vmem [shape: f32[2,4,256], index: 2, kind: input, shape index: {}]   ;;  %s679_s3 = inlined_call_operand.vmem [shape: f32[2,4,256], index: 3, kind: input, shape index: {}]   ;;  %s680_s4 = inlined_call_operand.vmem [shape: f32[2,1,256], index: 4, kind: input, shape index: {}]   ;;  %s681_s5 = inlined_call_operand.vmem [shape: f32[4,1], index: 5, kind: input, shape index: {}]   ;;  %s682_s6 = inlined_call_operand.vmem [shape: f32[4,4], index: 6, kind: input, shape index: {}]   ;;  %s683_s7 = inlined_call_operand.vmem [shape: f32[2,4,256], index: 7, kind: output, shape index: {}]  }
   0x1   :  { %12 = sst [smem:[#allocation2]] %s676_s0 }
   0x2 LB: > { %s546_s27 = sadd.s32 4294967295, %s586_s26   ;;  %p550_p0 = scmp.ge.s32.totalorder %s586_s26, 1  ;;  %s586_s26 = sphi %s632_s26, %s18_s26  }
   0x3   : > { %p267_p1 = scmp.lt.s32.totalorder %s586_s26, 3 }
   0x5   : > { %p268_p2 = pnand %p550_p0, %p267_p1 }
   0x6   : > { %p313_p3 = scmp.lt.s32.totalorder (!%p268_p2), %s546_s27, 1  ;;  %s337_s14 = sld [smem:[#allocation2]] (!%p268_p2) }
   0x7   : > { %271 = sbr.rel (%p268_p2) target bundleno = 302 (0x12e), region = 48 }
   0xc   : > { %v339_v0 = vld [vmem:[%s681_s5] sm:$0xf]  ;;  %v588_v1 = vmov 0   ;;  %s685_s27 = smov (!%p313_p3, %s546_s27), 1  ;;  %vm353_vm0 = vcmask 1043456   ;;  %s390_s18 = smul.f32 0.25, %s337_s14  ;;  %v387_v34 = vstv %s337_s14 }
   0xd   : > { %579 = vset.pattern.permute.xlu0 %v588_v1  ;;  %s643_s0 = sshll.u32 %s685_s27, 3  ;;  %s557_s10 = sshll.u32 %s685_s27, 1  ;;  %v395_v42 = vld [vmem:[%s682_s6] sm:$0xf]  ;;  %vm400_vm1 = vcmask 31744  }
   0xe   : > { %342 = vperm.xlu0 %579, %v339_v0   ;;  %s317_s9 = scalar_lea.vmem %s677_s1, %s643_s0  ;;  %s331_s13 = scalar_lea.vmem %s680_s4, %s557_s10  ;;  %v392_v36 = vstv %s390_s18 }
   0xf   : > { %v338_v2 = vld [vmem:[%s317_s9] sm:$0xff]  ;;  %s322_s17 = scalar_lea.vmem %s678_s2, %s643_s0  ;;  %s327_s21 = scalar_lea.vmem %s679_s3, %s643_s0 }
  0x10   : > { %346 = vst [vmem:[#allocation1] ss:$2 sm:$0xff] %v338_v2  ;;  %v368_v16 = vld [vmem:[%s331_s13] sm:$0x3]  ;;  %s336_s27 = scalar_lea.vmem %s683_s7, %s643_s0 }
  0x11   : > { %v370_v21 = vperm.slane %v368_v16, 0  ;;  %v371_v22 = vperm.slane %v368_v16, 1  ;;  %v380_v31 = vld [vmem:[%s322_s17] sm:$0xff] }
  0x12   : > { %v391_v35 = vld [vmem:[%s327_s21] sm:$0xff] }
  0x13   : > { %v393_v39 = vmul.f32 %v392_v36, %v391_v35 }
  0x17   : > { %v347_v3 = vld.sshfl [vmem:[#allocation1] sm:$0xff pattern:$0x75316420]  ;;  %v348_v4 = vld.sshfl [vmem:[#allocation1 + $0x8] sm:$0xff pattern:$0x75316420] }
  0x80   : > { %v343_v5 = vpop.permute.xlu0 %342 }
  0x81   : > { %v351_v6 = vmul.f32 %v347_v3, %v343_v5  ;;  %v352_v7 = vmul.f32 %v348_v4, %v343_v5 }
  0x83   : > { %v354_v8 = vsel %vm353_vm0, %v351_v6, 0.0  ;;  %v361_v9 = vsel %vm353_vm0, %v352_v7, 0.0 }
  0x84   : > { %v355_v10 = vrot.slane %v354_v8, 4  ;;  %v362_v11 = vrot.slane %v361_v9, 4 }
  0x86   : > { %v356_v12 = vadd.f32 %v355_v10, %v354_v8  ;;  %v363_v13 = vadd.f32 %v362_v11, %v361_v9 }
  0x88   : > { %v357_v14 = vrot.slane %v356_v12, 2  ;;  %v364_v15 = vrot.slane %v363_v13, 2 }
  0x8a   : > { %v358_v17 = vadd.f32 %v357_v14, %v356_v12  ;;  %v365_v18 = vadd.f32 %v364_v15, %v363_v13 }
  0x8c   : > { %v359_v19 = vrot.slane %v358_v17, 1  ;;  %v366_v20 = vrot.slane %v365_v18, 1 }
  0x8e   : > { %v360_v23 = vadd.f32 %v359_v19, %v358_v17  ;;  %v367_v24 = vadd.f32 %v366_v20, %v365_v18 }
  0x90   : > { %v374_v25 = vsub.f32 %v360_v23, %v370_v21  ;;  %v375_v26 = vsub.f32 %v367_v24, %v371_v22 }
  0x92   : > { %v376_v27 = vperm.slane %v374_v25, 0  ;;  %v377_v28 = vperm.slane %v375_v26, 0 }
  0x94   : > { %v379_v29 = vmul.f32 %v377_v28, %v343_v5  ;;  %v378_v30 = vmul.f32 %v376_v27, %v343_v5 }
  0x96   : > { %v383_v32 = vrot.slane %v379_v29, 4 }
  0x98   : > { %v384_v33 = vsel %vm353_vm0, %v378_v30, %v383_v32 }
  0x99   : > { %v386_v37 = vsub.f32 %v380_v31, %v384_v33 }
  0x9b   : > { %v388_v38 = vmul.f32 %v387_v34, %v386_v37 }
  0x9d   : > { %v389_v40 = vadd.f32 %v388_v38, %v338_v2 }
  0x9f   : > { %v394_v41 = vsub.f32 %v389_v40, %v393_v39 }
  0xa1   : > { %397 = vst [vmem:[#allocation1] ss:$2 sm:$0xff] %v394_v41 }
  0xa8   : > { %v398_v43 = vld.sshfl [vmem:[#allocation1] sm:$0xff pattern:$0x75316420]  ;;  %v399_v44 = vld.sshfl [vmem:[#allocation1 + $0x8] sm:$0xff pattern:$0x75316420] }
  0xa9   : > { %560 = vmatpush.msk.msra.mxu0 %vm353_vm0, %v398_v43  ;;  %562 = vmatpush.msk.msra.mxu1 %vm353_vm0, %v399_v44 }
  0xaa   : > { %563 = vmatmul.msk.f32.vlgmr.msra.gmra.mxu1 %vm400_vm1, %v395_v42  ;;  %561 = vmatmul.msk.f32.vlgmr.msra.gmra.mxu0 %vm400_vm1, %v395_v42 }
 0x127   : > { %v445_v45 = vpop.f32.mrf.mxu1  ;;  %v425_v46 = vpop.f32.mrf.mxu0 }
 0x128   : > { %v450_v47 = vrot.slane %v445_v45, 4 }
 0x12a   : > { %v451_v48 = vsel %vm353_vm0, %v425_v46, %v450_v47 }
 0x12b   : > { %v453_v49 = vadd.f32 %v451_v48, %v394_v41 }
 0x12d   : > { %454 = vst [vmem:[%s336_s27] sm:$0xff] %v453_v49 }
 0x12e PF: > { %s18_s26 = sadd.s32 1, %s586_s26  }
 0x12f   : > { %p15_p4 = scmp.ge.s32.totalorder %s18_s26, 4  }
 0x131   :  { %17 = sbr.rel (!%p15_p4) target bundleno = 2 (0x2), region = 87 }

</bundles_post_ra>
